<compile_context>
chip_gen: v5e
topology: v5e:2x2
jax: 0.10.0
libtpu: 0.0.40
codegen_flags: <defaults>
</compile_context>

<pallas_src>
import functools

import jax
import jax.numpy as jnp
from jax import lax
from jax.experimental import pallas as pl
from jax.experimental.pallas import tpu as pltpu


def _round_up(x, m):
    return ((x + m - 1) // m) * m


def _make_kernel(tb, c_pad, n_rows, n_cols):
    """Per-tile kernel; n_rows/n_cols are the ORIGINAL (unpadded) sizes."""

    def kernel(pred_ref, label_ref, out_ref):
        pred = pred_ref[...].astype(jnp.float32)
        lab = label_ref[...].astype(jnp.float32) * 10.0  # temperature * 10

        # Columns >= n_cols are lane padding (edge-replicated values).
        col_ok = lax.broadcasted_iota(jnp.int32, (tb, c_pad), 1) < n_cols

        # log_softmax(prediction, axis=1) over valid columns.
        # Edge padding means padded values duplicate real ones, so the plain
        # row max is already the valid max and every shifted value is <= 0
        # (exp never overflows); the masked sum excludes the duplicates.
        pmax = jnp.max(pred, axis=1, keepdims=True)
        pshift = pred - pmax
        exp_p = jnp.where(col_ok, jnp.exp(pshift), 0.0)
        lse = jnp.log(jnp.sum(exp_p, axis=1, keepdims=True))
        logp1 = pshift - lse

        # softmax(label * 10, axis=1), kept unnormalized:
        #   p2 = e / sum_e,  log p2 = lshift - log_z.
        lmax = jnp.max(lab, axis=1, keepdims=True)
        lshift = lab - lmax
        e = jnp.where(col_ok, jnp.exp(lshift), 0.0)
        sum_e = jnp.sum(e, axis=1, keepdims=True)
        log_z = jnp.log(sum_e)

        # sum_j p2_j * (log p2_j - logp1_j)
        #   = (1/sum_e) * sum_j e_j * ((lshift_j - log_z) - logp1_j)
        # e_j == 0 (underflow or masked padding) multiplies a finite bracket,
        # giving exactly 0 -- PyTorch's xlogy convention.
        row_unnorm = jnp.sum(e * ((lshift - log_z) - logp1), axis=1,
                             keepdims=True)
        row_kl = row_unnorm * pl.reciprocal(sum_e, approx=False)  # [tb, 1]

        # Zero the row padding (edge-replicated rows beyond n_rows).
        row_ids = (lax.broadcasted_iota(jnp.int32, (tb, 1), 0)
                   + pl.program_id(0) * tb)
        row_kl = jnp.where(row_ids < n_rows, row_kl, 0.0)

        partial = jnp.sum(row_kl)  # scalar partial sum for this row tile
        # Each grid step writes its OWN tile-aligned (1, 8, 128) block: no two
        # steps touch the same HBM tile, so no read-modify-write clobbering.
        out_ref[...] = jnp.broadcast_to(partial, out_ref.shape).astype(
            jnp.float32)

    return kernel


@functools.partial(jax.jit, static_argnames=("max_rows_per_tile",))
def kl_loss(prediction, label, *, max_rows_per_tile=512):
    """Pallas implementation of KLLoss.forward(prediction, label) -> scalar."""
    assert prediction.shape == label.shape and prediction.ndim == 2
    B, C = prediction.shape

    # Lane-dense class axis.
    c_pad = _round_up(max(C, 128), 128)

    # Row tile: multiple of 8 sublanes.  Budget ~8 live f32 [tb, c_pad]
    # temporaries plus double-buffered inputs under the scoped-VMEM default.
    tb = (12 * 1024 * 1024) // (8 * 4 * c_pad)
    tb = min(tb, max_rows_per_tile, _round_up(B, 8))
    tb = max(8, (tb // 8) * 8)
    b_pad = _round_up(B, tb)
    num_tiles = b_pad // tb

    # Edge-pad: padded entries replicate boundary values, so they stay in the
    # data's numeric range (no huge magnitudes through exp/log); the kernel
    # masks them out exactly.  Skip entirely when already aligned.
    if b_pad != B or c_pad != C:
        pad_cfg = ((0, b_pad - B), (0, c_pad - C))
        pred_p = jnp.pad(prediction, pad_cfg, mode="edge")
        label_p = jnp.pad(label, pad_cfg, mode="edge")
    else:
        pred_p, label_p = prediction, label

    kernel = _make_kernel(tb, c_pad, B, C)

    partials = pl.pallas_call(
        kernel,
        out_shape=jax.ShapeDtypeStruct((num_tiles, 8, 128), jnp.float32),
        grid_spec=pltpu.PrefetchScalarGridSpec(
            num_scalar_prefetch=0,
            grid=(num_tiles,),
            in_specs=[
                pl.BlockSpec((tb, c_pad), lambda i: (i, 0)),
                pl.BlockSpec((tb, c_pad), lambda i: (i, 0)),
            ],
            out_specs=pl.BlockSpec((1, 8, 128), lambda i: (i, 0, 0)),
        ),
        compiler_params=pltpu.CompilerParams(
            dimension_semantics=("parallel",),
            vmem_limit_bytes=32 * 1024 * 1024,
        ),
    )(pred_p, label_p)

    total = jnp.sum(partials[:, 0, 0])
    # reduction='mean' over the ORIGINAL B*C elements, then * batch_size.
    return (total / jnp.float32(B * C)) * jnp.float32(B)


def kl_loss_ref(prediction, label):
    """Pure-JAX reference mirroring the PyTorch module exactly."""
    B = prediction.shape[0]
    logp1 = jax.nn.log_softmax(prediction.astype(jnp.float32), axis=1)
    p2 = jax.nn.softmax(label.astype(jnp.float32) * 10.0, axis=1)
    elem = jnp.where(
        p2 > 0.0,
        p2 * (jnp.log(jnp.where(p2 > 0.0, p2, 1.0)) - logp1),
        0.0,
    )
    return jnp.mean(elem) * B


if __name__ == "__main__":
    key = jax.random.PRNGKey(0)

    # Case 1: typical GFSLT-VLP use — small similarity-matrix-like input.
    # C=32 exercises lane padding to 128.
    B, C = 8, 32
    kp, klab = jax.random.split(key)
    prediction = jax.random.normal(kp, (B, C), dtype=jnp.float32)
    label = jax.random.normal(klab, (B, C), dtype=jnp.float32)
    out = jax.block_until_ready(kl_loss(prediction, label))
    ref = jax.block_until_ready(kl_loss_ref(prediction, label))
    assert jnp.allclose(out, ref, rtol=1e-4, atol=1e-5), (out, ref)

    # Case 2: ragged shapes — row padding, column padding and a multi-tile
    # grid with per-tile partial sums (the case that previously produced NaN).
    B2, C2 = 20, 200
    kp2, kl2 = jax.random.split(klab)
    pred2 = jax.random.normal(kp2, (B2, C2), dtype=jnp.float32)
    lab2 = jax.random.normal(kl2, (B2, C2), dtype=jnp.float32)
    out2 = jax.block_until_ready(kl_loss(pred2, lab2, max_rows_per_tile=8))
    ref2 = jax.block_until_ready(kl_loss_ref(pred2, lab2))
    assert jnp.allclose(out2, ref2, rtol=1e-4, atol=1e-5), (out2, ref2)

    # Case 3: perfectly aligned shapes — exercises the no-padding fast path.
    B3, C3 = 16, 128
    kp3, kl3 = jax.random.split(kl2)
    pred3 = jax.random.normal(kp3, (B3, C3), dtype=jnp.float32)
    lab3 = jax.random.normal(kl3, (B3, C3), dtype=jnp.float32)
    out3 = jax.block_until_ready(kl_loss(pred3, lab3))
    ref3 = jax.block_until_ready(kl_loss_ref(pred3, lab3))
    assert jnp.allclose(out3, ref3, rtol=1e-4, atol=1e-5), (out3, ref3)

    print("KERNEL_OK")
</pallas_src>

<mosaic_0001>
module attributes {stable_mosaic.version = 11 : i64} {
  func.func @kernel(%arg0: i32, %arg1: memref<8x128xf32, #tpu.memory_space<vmem>>, %arg2: memref<8x128xf32, #tpu.memory_space<vmem>>, %arg3: memref<1x8x128xf32, #tpu.memory_space<vmem>>) attributes {dimension_semantics = [#tpu.dimension_semantics<parallel>], iteration_bounds = array<i64: 1>, scalar_prefetch = 0 : i64, scratch_operands = 0 : i64, tpu.core_type = #tpu.core_type<tc>, window_params = [{transform_indices = @transform_0, window_bounds = array<i64: 8, 128>}, {transform_indices = @transform_1, window_bounds = array<i64: 8, 128>}, {transform_indices = @transform_2, window_bounds = array<i64: 1, 8, 128>}]} {
    %c0 = arith.constant 0 : index
    %c0_0 = arith.constant 0 : index
    %0 = vector.load %arg1[%c0, %c0_0] : memref<8x128xf32, #tpu.memory_space<vmem>>, vector<8x128xf32>
    %c0_1 = arith.constant 0 : index
    %c0_2 = arith.constant 0 : index
    %1 = vector.load %arg2[%c0_1, %c0_2] : memref<8x128xf32, #tpu.memory_space<vmem>>, vector<8x128xf32>
    %cst = arith.constant 1.000000e+01 : f32
    %2 = vector.broadcast %cst : f32 to vector<8x128xf32>
    %3 = arith.mulf %1, %2 : vector<8x128xf32>
    %4 = tpu.iota {dimensions = array<i32: 1>} : vector<8x128xi32>
    %c32_i32 = arith.constant 32 : i32
    %5 = vector.broadcast %c32_i32 : i32 to vector<8x128xi32>
    %6 = arith.cmpi slt, %4, %5 : vector<8x128xi32>
    %cst_3 = arith.constant dense<0xFF800000> : vector<8xf32>
    %7 = vector.multi_reduction <maximumf>, %0, %cst_3 [1] : vector<8x128xf32> to vector<8xf32>
    %8 = vector.shape_cast %7 : vector<8xf32> to vector<8x1xf32>
    %9 = vector.broadcast %8 : vector<8x1xf32> to vector<8x128xf32>
    %10 = arith.subf %0, %9 : vector<8x128xf32>
    %11 = math.exp %10 : vector<8x128xf32>
    %cst_4 = arith.constant 0.000000e+00 : f32
    %12 = vector.broadcast %cst_4 : f32 to vector<8x128xf32>
    %13 = arith.select %6, %11, %12 : vector<8x128xi1>, vector<8x128xf32>
    %cst_5 = arith.constant dense<0.000000e+00> : vector<8xf32>
    %14 = vector.multi_reduction <add>, %13, %cst_5 [1] : vector<8x128xf32> to vector<8xf32>
    %15 = vector.shape_cast %14 : vector<8xf32> to vector<8x1xf32>
    %16 = math.log %15 : vector<8x1xf32>
    %17 = vector.broadcast %16 : vector<8x1xf32> to vector<8x128xf32>
    %18 = arith.subf %10, %17 : vector<8x128xf32>
    %cst_6 = arith.constant dense<0xFF800000> : vector<8xf32>
    %19 = vector.multi_reduction <maximumf>, %3, %cst_6 [1] : vector<8x128xf32> to vector<8xf32>
    %20 = vector.shape_cast %19 : vector<8xf32> to vector<8x1xf32>
    %21 = vector.broadcast %20 : vector<8x1xf32> to vector<8x128xf32>
    %22 = arith.subf %3, %21 : vector<8x128xf32>
    %23 = math.exp %22 : vector<8x128xf32>
    %cst_7 = arith.constant 0.000000e+00 : f32
    %24 = vector.broadcast %cst_7 : f32 to vector<8x128xf32>
    %25 = arith.select %6, %23, %24 : vector<8x128xi1>, vector<8x128xf32>
    %cst_8 = arith.constant dense<0.000000e+00> : vector<8xf32>
    %26 = vector.multi_reduction <add>, %25, %cst_8 [1] : vector<8x128xf32> to vector<8xf32>
    %27 = vector.shape_cast %26 : vector<8xf32> to vector<8x1xf32>
    %28 = math.log %27 : vector<8x1xf32>
    %29 = vector.broadcast %28 : vector<8x1xf32> to vector<8x128xf32>
    %30 = arith.subf %22, %29 : vector<8x128xf32>
    %31 = arith.subf %30, %18 : vector<8x128xf32>
    %32 = arith.mulf %25, %31 : vector<8x128xf32>
    %cst_9 = arith.constant dense<0.000000e+00> : vector<8xf32>
    %33 = vector.multi_reduction <add>, %32, %cst_9 [1] : vector<8x128xf32> to vector<8xf32>
    %34 = vector.shape_cast %33 : vector<8xf32> to vector<8x1xf32>
    %35 = tpu.reciprocal %27 : vector<8x1xf32> -> vector<8x1xf32>
    %36 = arith.mulf %34, %35 : vector<8x1xf32>
    %37 = tpu.iota {dimensions = array<i32: 0>} : vector<8x1xi32>
    %c8_i32 = arith.constant 8 : i32
    %38 = arith.muli %arg0, %c8_i32 : i32
    %39 = vector.broadcast %38 : i32 to vector<8x1xi32>
    %40 = arith.addi %37, %39 : vector<8x1xi32>
    %c8_i32_10 = arith.constant 8 : i32
    %41 = vector.broadcast %c8_i32_10 : i32 to vector<8x1xi32>
    %42 = arith.cmpi slt, %40, %41 : vector<8x1xi32>
    %cst_11 = arith.constant 0.000000e+00 : f32
    %43 = vector.broadcast %cst_11 : f32 to vector<8x1xf32>
    %44 = arith.select %42, %36, %43 : vector<8x1xi1>, vector<8x1xf32>
    %45 = vector.shape_cast %44 : vector<8x1xf32> to vector<1x8x1xf32>
    %cst_12 = arith.constant dense<0.000000e+00> : vector<1xf32>
    %46 = vector.multi_reduction <add>, %45, %cst_12 [1, 2] : vector<1x8x1xf32> to vector<1xf32>
    %47 = vector.shape_cast %46 : vector<1xf32> to vector<1x1x1xf32>
    %48 = vector.extract %47[0, 0, 0] : f32 from vector<1x1x1xf32>
    %49 = vector.broadcast %48 : f32 to vector<1x8x128xf32>
    %c0_13 = arith.constant 0 : index
    %c0_14 = arith.constant 0 : index
    %c0_15 = arith.constant 0 : index
    %50 = vector.load %arg3[%c0_13, %c0_14, %c0_15] : memref<1x8x128xf32, #tpu.memory_space<vmem>>, vector<1x8x128xf32>
    tpu.vector_store %arg3[%c0_13, %c0_14, %c0_15], %49 {strides = array<i32>} : memref<1x8x128xf32, #tpu.memory_space<vmem>>, vector<1x8x128xf32>,
    return
  }
  func.func @transform_0(%arg0: i32) -> (i32, i32) {
    %c0_i32 = arith.constant 0 : i32
    %c0_i32_0 = arith.constant 0 : i32
    return %arg0, %c0_i32 : i32, i32
  }
  func.func @transform_1(%arg0: i32) -> (i32, i32) {
    %c0_i32 = arith.constant 0 : i32
    %c0_i32_0 = arith.constant 0 : i32
    return %arg0, %c0_i32 : i32, i32
  }
  func.func @transform_2(%arg0: i32) -> (i32, i32, i32) {
    %c0_i32 = arith.constant 0 : i32
    %c0_i32_0 = arith.constant 0 : i32
    %c0_i32_1 = arith.constant 0 : i32
    return %arg0, %c0_i32, %c0_i32_0 : i32, i32, i32
  }
}

</mosaic_0001>

<bundles_post_ra>
// kernel: kl_loss.1
= control target key start
LH: loop header
LB: loop body
LE: loop exit
PB: predicated region body
PF: predicated region fallthrough
CT: control target
= control target key end

     0   :  { %v14_v5 = vlaneseq  ;;  %vm65_vm5 = vcmask 7168   ;;  %s118_s0 = inlined_call_operand.vmem [shape: f32[8,128], index: 0, kind: input, shape index: {}]   ;;  %s119_s1 = inlined_call_operand.vmem [shape: f32[8,128], index: 1, kind: input, shape index: {}]   ;;  %s120_s2 = inlined_call_operand.vmem [shape: f32[1,8,128], index: 2, kind: output, shape index: {}]  }
   0x1   :  { %v11_v0 = vld [vmem:[%s118_s0] sm:$0xff] }
   0x2   :  { %17 = vmax.xlane.f32.xlu0 %v11_v0  ;;  %v12_v1 = vld [vmem:[%s119_s1] sm:$0xff]  ;;  %v15_v7 = vand.u32 127, %v14_v5 }
   0x3   :  { %v13_v2 = vmul.f32 10.0, %v12_v1 }
   0x4   :  { %vm16_vm0 = vcmp.lt.s32.totalorder %v15_v7, 32 }
   0xa   :  { %28 = vmax.xlane.f32.xlu0 %v13_v2 }
  0x75   :  { %v18_v3 = vpop.xlane.xlu0 %17 }
  0x76   :  { %v19_v4 = vsub.f32 %v11_v0, %v18_v3 }
  0x78   :  { %v20_v6 = vmul.f32 1.442695, %v19_v4 }
  0x7a   :  { %84 = vpow2.f32 %v20_v6 }
  0x7d   :  { %v29_v8 = vpop.xlane.xlu0 %28 }
  0x7e   :  { %v30_v9 = vsub.f32 %v13_v2, %v29_v8 }
  0x80   :  { %v85_v10 = vpop.eup %84  ;;  %v31_v11 = vmul.f32 1.442695, %v30_v9 }
  0x81   :  { %v22_v12 = vsel %vm16_vm0, %v85_v10, 0.0 }
  0x82   :  { %86 = vpow2.f32 %v31_v11  ;;  %23 = vadd.xlane.f32.xlu1 %v22_v12 }
  0x88   :  { %v87_v13 = vpop.eup %86 }
  0x89   :  { %v33_v14 = vsel %vm16_vm0, %v87_v13, 0.0 }
  0x8a   :  { %34 = vadd.xlane.f32.xlu1 %v33_v14 }
  0xf5   :  { %v24_v15 = vpop.xlane.xlu1 %23 }
  0xf6   :  { %88 = vlog2.f32 %v24_v15 }
  0xfc   :  { %v89_v17 = vpop.eup %88 }
  0xfd   :  { %v35_v16 = vpop.xlane.xlu1 %34  ;;  %v26_v18 = vmul.f32 0.6931472, %v89_v17 }
  0xfe   :  { %90 = vlog2.f32 %v35_v16  ;;  %v54_v30 = vand.u32 2147483648, %v35_v16  ;;  %vm48_vm2 = vweird.f32 %v35_v16  ;;  %v52_v31 = vand.u32 2147483647, %v35_v16 }
  0xff   :  { %v27_v21 = vsub.f32 %v19_v4, %v26_v18  ;;  %92 = vrcp.f32 %v35_v16 }
 0x100   :  { %v55_v33 = vor.u32 1.1754944e-38, %v54_v30  ;;  %vm53_vm4 = vcmp.eq.f32.partialorder %v52_v31, 8.507059e+37 }
 0x104   :  { %v91_v19 = vpop.eup %90 }
 0x105   :  { %v37_v20 = vmul.f32 0.6931472, %v91_v19  ;;  %v93_v25 = vpop.eup %92 }
 0x106   :  { %v44_v26 = vmul.f32 %v93_v25, %v35_v16  ;;  %vm49_vm1 = vweird.f32 %v93_v25 }
 0x107   :  { %v38_v22 = vsub.f32 %v30_v9, %v37_v20  ;;  %vm50_vm3 = vmor %vm48_vm2, %vm49_vm1 }
 0x108   :  { %v45_v27 = vsub.f32 1.0, %v44_v26 }
 0x109   :  { %v39_v23 = vsub.f32 %v38_v22, %v27_v21 }
 0x10a   :  { %v46_v28 = vmul.f32 %v93_v25, %v45_v27 }
 0x10b   :  { %v40_v24 = vmul.f32 %v39_v23, %v33_v14 }
 0x10c   :  { %v47_v29 = vadd.f32 %v93_v25, %v46_v28 }
 0x10d   :  { %41 = vadd.xlane.f32.xlu2 %v40_v24 }
 0x10e   :  { %v51_v32 = vsel %vm50_vm3, %v93_v25, %v47_v29 }
 0x10f   :  { %v56_v34 = vsel %vm53_vm4, %v55_v33, %v51_v32 }
 0x180   :  { %v42_v35 = vpop.xlane.xlu2 %41 }
 0x181   :  { %v57_v36 = vmul.f32 %v56_v34, %v42_v35 }
 0x183   :  { %v66_v37 = vsel %vm65_vm5, %v57_v36, 0.0 }
 0x184   :  { %67 = vadd.xlane.f32.xlu2 %v66_v37 }
 0x1f7   :  { %v68_v38 = vpop.xlane.xlu2 %67 }
 0x1f8   :  { %v69_v39 = vrot.slane %v68_v38, 4 }
 0x1fa   :  { %v70_v40 = vadd.f32 %v69_v39, %v68_v38 }
 0x1fc   :  { %v71_v41 = vrot.slane %v70_v40, 2 }
 0x1fe   :  { %v72_v42 = vadd.f32 %v71_v41, %v70_v40 }
 0x200   :  { %v73_v43 = vrot.slane %v72_v42, 1 }
 0x202   :  { %v74_v44 = vadd.f32 %v73_v43, %v72_v42 }
 0x204   :  { %82 = vpush %v74_v44 }
 0x235   :  { %s83_s0 = spop %82 }
 0x236   :  { %v76_v45 = vstv %s83_s0 }
 0x237   :  { %77 = vst [vmem:[%s120_s2] sm:$0xff] %v76_v45 }

</bundles_post_ra>
